<compile_context>
chip_gen: v7x
topology: tpu7x:2x2x1
jax: 0.10.0
libtpu: 0.0.40
codegen_flags: <defaults>
</compile_context>

<pallas_src>
import functools
import math

import numpy as np
import jax
import jax.numpy as jnp
from jax.experimental import pallas as pl
from jax.experimental.pallas import tpu as pltpu

LOG2PI = float(np.log(2.0 * np.pi))


def _round_up(x, m):
    return (x + m - 1) // m * m


def _cdiv(a, b):
    return (a + b - 1) // b


def _softplus(x):
    # PyTorch F.softplus(beta=1, threshold=20)
    return jnp.where(x > 20.0, x, jnp.log1p(jnp.exp(x)))


# ---------------------------------------------------------------------------
# Conv-as-matmul kernel: one (batch, L-tile) grid step.
#   w_ref : (K, C_out, C_in) bf16   resident sampled weights
#   b_ref : (C_out, 1)       f32    resident sampled bias
#   x_hbm : (B, C_in, L_pad) bf16   raw HBM ref (memory_space=pl.ANY), DMA'd manually
#   out   : (C_out, tl)      f32    lane-dense block, already NCL-ordered
# ---------------------------------------------------------------------------
def _conv_kernel(K, dilation, stride, tl, w_ref, b_ref, x_hbm, out_ref, xbuf, sem):
    bi = pl.program_id(0)
    j = pl.program_id(1)
    win = xbuf.shape[-1]
    start = pl.multiple_of(j * (tl * stride), 128)   # tl is a multiple of 128

    # Haloed input slab DMA.  No explicit double-buffering needed: the previous step's
    # (larger) f32 output writeback is pipelined by the out BlockSpec and overlaps this DMA,
    # and the matmul below is negligible, so the input copy hides under it.
    cp = pltpu.make_async_copy(x_hbm.at[bi, :, pl.ds(start, win)], xbuf, sem)
    cp.start()
    cp.wait()

    acc = None
    for k in range(K):                                # K is tiny (kernel_size); unrolled
        if stride == 1:
            xk = xbuf[:, pl.ds(k * dilation, tl)]     # (C_in, tl) bf16, contiguous lanes
        else:
            # TODO(synk): lane-strided load for stride>1; correct but may lower slowly.
            xk = xbuf[:, pl.ds(k * dilation, tl, stride)]
        term = jax.lax.dot_general(
            w_ref[k], xk, (((1,), (0,)), ((), ())),
            preferred_element_type=jnp.float32)       # bf16 in, f32 accumulate
        acc = term if acc is None else acc + term
    out_ref[...] = acc + b_ref[...]                   # (C_out,1) broadcasts over lanes


def bayes_conv1d_normalq(x, w_mu, w_p, eps_w, b_mu, b_p, eps_b,
                         stride=1, padding=0, dilation=1, prior_sigma=0.1,
                         tile_l=32768):
    """Returns (output[N, C_out, L_out], lqw, lpw) — matches the PyTorch sampling forward."""
    B, C_in, L_in = x.shape
    C_out, _, K = w_mu.shape
    f32 = jnp.float32

    w_mu = w_mu.astype(f32); w_p = w_p.astype(f32); eps_w = eps_w.astype(f32)
    b_mu = b_mu.astype(f32); b_p = b_p.astype(f32); eps_b = eps_b.astype(f32)

    # ---- weight/bias sampling + log-likelihoods: plain jnp (XLA fuses ~100 elements) -------
    std_w = 1e-6 + _softplus(w_p)
    std_b = 1e-6 + _softplus(b_p)
    W = w_mu + std_w * eps_w                          # (C_out, C_in, K)
    b = b_mu + std_b * eps_b                          # (C_out,)

    n_elem = float(W.size + b.size)
    # lqw: (W - mu)/std == eps exactly -> no per-element divide.
    lqw = (-0.5 * LOG2PI * n_elem
           - jnp.sum(jnp.log(std_w)) - jnp.sum(jnp.log(std_b))
           - 0.5 * (jnp.sum(eps_w * eps_w) + jnp.sum(eps_b * eps_b)))
    # lpw: N(0, prior_sigma^2) with constants folded at trace time.
    lpw = (n_elem * (-0.5 * LOG2PI - math.log(prior_sigma))
           - (0.5 / (prior_sigma * prior_sigma)) * (jnp.sum(W * W) + jnp.sum(b * b)))

    # ---- conv geometry & tiling -------------------------------------------------------------
    L_eff = L_in + 2 * padding
    L_out = (L_eff - dilation * (K - 1) - 1) // stride + 1
    assert L_out >= 1, "input too short for this kernel/stride/dilation"

    full = _round_up(L_out, 128)
    tl = min(_round_up(tile_l, 128), full)
    n_tiles = _cdiv(L_out, tl)
    if B * n_tiles < 2 and L_out > 128:               # keep both v7x TensorCores busy
        n_tiles = 2
    tl = _round_up(_cdiv(L_out, n_tiles), 128)        # balance tiles (no mostly-padding tail)
    n_tiles = _cdiv(L_out, tl)

    halo = (K - 1) * dilation
    win = _round_up(tl * stride + halo, 128)          # haloed, lane-aligned input slab
    L_total = (n_tiles - 1) * (tl * stride) + win     # padded x length so every slab is in-bounds
    right_pad = L_total - (L_in + padding)

    # Single fused cast+pad pass over x: bf16 halves the streamed activation bytes.
    x_pad = jnp.pad(x.astype(jnp.bfloat16), ((0, 0), (0, 0), (padding, right_pad)))

    W_kern = jnp.transpose(W, (2, 0, 1)).astype(jnp.bfloat16)   # (K, C_out, C_in)
    b_kern = b.reshape(C_out, 1)                                 # f32

    out = pl.pallas_call(
        functools.partial(_conv_kernel, K, dilation, stride, tl),
        grid=(B, n_tiles),
        in_specs=[
            pl.BlockSpec((K, C_out, C_in), lambda bi, j: (0, 0, 0)),   # resident sampled W
            pl.BlockSpec((C_out, 1), lambda bi, j: (0, 0)),            # resident sampled bias
            pl.BlockSpec(memory_space=pl.ANY),                         # raw x in HBM, manual DMA
        ],
        out_specs=pl.BlockSpec((None, C_out, tl), lambda bi, j: (bi, 0, j)),
        out_shape=jax.ShapeDtypeStruct((B, C_out, L_out), jnp.float32),
        scratch_shapes=[pltpu.VMEM((C_in, win), jnp.bfloat16),
                        pltpu.SemaphoreType.DMA],
        compiler_params=pltpu.CompilerParams(
            dimension_semantics=("parallel", "parallel")),
    )(W_kern, b_kern, x_pad)

    return out, lqw, lpw


if __name__ == "__main__":
    key = jax.random.PRNGKey(0)
    k1, k2, k3, k4, k5, k6, k7 = jax.random.split(key, 7)

    # module config: n_in_channels=4, n_out_channels=8, kernel_size=3
    B, C_in, C_out, K, L = 2, 4, 8, 3, 16
    prior_sigma = 0.1  # isotropic Gaussian prior N(0, 0.1^2)

    x = jax.random.normal(k1, (B, C_in, L), jnp.float32)
    w_mu = jax.random.uniform(k2, (C_out, C_in, K), jnp.float32, -0.1, 0.1)
    w_p = jax.random.uniform(k3, (C_out, C_in, K), jnp.float32, -3.0, -2.0)
    b_mu = jax.random.uniform(k4, (C_out,), jnp.float32, -0.1, 0.1)
    b_p = jax.random.uniform(k5, (C_out,), jnp.float32, -3.0, -2.0)
    eps_w = jax.random.normal(k6, (C_out, C_in, K), jnp.float32)
    eps_b = jax.random.normal(k7, (C_out,), jnp.float32)

    out, lqw, lpw = bayes_conv1d_normalq(
        x, w_mu, w_p, eps_w, b_mu, b_p, eps_b, prior_sigma=prior_sigma)
    jax.block_until_ready((out, lqw, lpw))

    # pure-JAX reference for correctness
    std_w = 1e-6 + _softplus(w_p)
    std_b = 1e-6 + _softplus(b_p)
    W = w_mu + std_w * eps_w
    b = b_mu + std_b * eps_b
    ref = jax.lax.conv_general_dilated(
        x, W, window_strides=(1,), padding="VALID",
        dimension_numbers=("NCH", "OIH", "NCH"),
        precision=jax.lax.Precision.HIGHEST) + b[None, :, None]

    def gll(xv, mu, sig):
        return jnp.sum(-0.5 * LOG2PI - jnp.log(sig) - 0.5 * ((xv - mu) / sig) ** 2)

    lqw_ref = gll(W, w_mu, std_w) + gll(b, b_mu, std_b)
    lpw_ref = gll(W, 0.0, jnp.float32(prior_sigma)) + gll(b, 0.0, jnp.float32(prior_sigma))

    # conv tolerance covers bf16-streamed activations/weights with f32 accumulation;
    # log-likelihood scalars are pure f32 math -> tight tolerance.
    np.testing.assert_allclose(np.asarray(out), np.asarray(ref), rtol=2e-2, atol=2e-2)
    np.testing.assert_allclose(float(lqw), float(lqw_ref), rtol=1e-4, atol=1e-3)
    np.testing.assert_allclose(float(lpw), float(lpw_ref), rtol=1e-4, atol=1e-3)

    print("KERNEL_OK")
</pallas_src>

<mosaic_0001>
module attributes {stable_mosaic.version = 11 : i64} {
  func.func @_conv_kernel(%arg0: i32, %arg1: i32, %arg2: memref<3x8x4xbf16, #tpu.memory_space<vmem>>, %arg3: memref<8x1xf32, #tpu.memory_space<vmem>>, %arg4: memref<2x4x256xbf16, #tpu.memory_space<any>>, %arg5: memref<1x8x128xf32, #tpu.memory_space<vmem>>, %arg6: memref<4x256xbf16, #tpu.memory_space<vmem>>, %arg7: memref<!tpu.dma_semaphore, #tpu.memory_space<semaphore_mem>>) attributes {dimension_semantics = [#tpu.dimension_semantics<parallel>, #tpu.dimension_semantics<parallel>], iteration_bounds = array<i64: 2, 1>, scalar_prefetch = 0 : i64, scratch_operands = 2 : i64, tpu.core_type = #tpu.core_type<tc>, window_params = [{pipeline_mode = #tpu.pipeline_mode<synchronous>, transform_indices = @transform_0, window_bounds = array<i64: 3, 8, 4>}, {pipeline_mode = #tpu.pipeline_mode<synchronous>, transform_indices = @transform_1, window_bounds = array<i64: 8, 1>}, {}, {transform_indices = @transform_3, window_bounds = array<i64: 1, 8, 128>}]} {
    %c128_i32 = arith.constant 128 : i32
    %0 = arith.muli %arg1, %c128_i32 : i32
    %1 = tpu.assume_multiple %0, 128 : i32
    %c0_i32 = arith.constant 0 : i32
    %2 = tpu.memref_slice %arg4[%arg0, %c0_i32, %1] : memref<2x4x256xbf16, #tpu.memory_space<any>> -> memref<1x4x256xbf16, #tpu.memory_space<any>>
    %3 = tpu.memref_squeeze %2 : memref<1x4x256xbf16, #tpu.memory_space<any>> -> memref<4x256xbf16, #tpu.memory_space<any>>
    tpu.enqueue_dma source(%3 : memref<4x256xbf16, #tpu.memory_space<any>>) target(%arg6 : memref<4x256xbf16, #tpu.memory_space<vmem>>) target_semaphore(%arg7 : memref<!tpu.dma_semaphore, #tpu.memory_space<semaphore_mem>>)
    %c0_i32_0 = arith.constant 0 : i32
    %4 = tpu.memref_slice %arg4[%arg0, %c0_i32_0, %1] : memref<2x4x256xbf16, #tpu.memory_space<any>> -> memref<1x4x256xbf16, #tpu.memory_space<any>>
    %5 = tpu.memref_squeeze %4 : memref<1x4x256xbf16, #tpu.memory_space<any>> -> memref<4x256xbf16, #tpu.memory_space<any>>
    tpu.wait_dma2 semaphore(%arg7 : memref<!tpu.dma_semaphore, #tpu.memory_space<semaphore_mem>>) src(%5 : memref<4x256xbf16, #tpu.memory_space<any>>) dst(%arg6 : memref<4x256xbf16, #tpu.memory_space<vmem>>)
    %c0 = arith.constant 0 : index
    %c0_1 = arith.constant 0 : index
    %6 = vector.load %arg6[%c0, %c0_1] : memref<4x256xbf16, #tpu.memory_space<vmem>>, vector<4x128xbf16>
    %c0_2 = arith.constant 0 : index
    %c0_3 = arith.constant 0 : index
    %c0_4 = arith.constant 0 : index
    %7 = vector.load %arg2[%c0_2, %c0_3, %c0_4] : memref<3x8x4xbf16, #tpu.memory_space<vmem>>, vector<1x8x4xbf16>
    %8 = vector.shape_cast %7 : vector<1x8x4xbf16> to vector<8x4xbf16>
    %cst = arith.constant dense<0.000000e+00> : vector<8x128xf32>
    %9 = tpu.matmul %8, %6, %cst {dimension_numbers = #tpu.dot_dimension_numbers<[1], [0], [0], [1], [0, 0, 1, 1], [], []>} : vector<8x4xbf16>, vector<4x128xbf16>, vector<8x128xf32> -> vector<8x128xf32>
    %c0_5 = arith.constant 0 : index
    %c1 = arith.constant 1 : index
    %10 = vector.load %arg6[%c0_5, %c1] : memref<4x256xbf16, #tpu.memory_space<vmem>>, vector<4x128xbf16>
    %c1_6 = arith.constant 1 : index
    %c0_7 = arith.constant 0 : index
    %c0_8 = arith.constant 0 : index
    %11 = vector.load %arg2[%c1_6, %c0_7, %c0_8] : memref<3x8x4xbf16, #tpu.memory_space<vmem>>, vector<1x8x4xbf16>
    %12 = vector.shape_cast %11 : vector<1x8x4xbf16> to vector<8x4xbf16>
    %cst_9 = arith.constant dense<0.000000e+00> : vector<8x128xf32>
    %13 = tpu.matmul %12, %10, %cst_9 {dimension_numbers = #tpu.dot_dimension_numbers<[1], [0], [0], [1], [0, 0, 1, 1], [], []>} : vector<8x4xbf16>, vector<4x128xbf16>, vector<8x128xf32> -> vector<8x128xf32>
    %14 = arith.addf %9, %13 : vector<8x128xf32>
    %c0_10 = arith.constant 0 : index
    %c2 = arith.constant 2 : index
    %15 = vector.load %arg6[%c0_10, %c2] : memref<4x256xbf16, #tpu.memory_space<vmem>>, vector<4x128xbf16>
    %c2_11 = arith.constant 2 : index
    %c0_12 = arith.constant 0 : index
    %c0_13 = arith.constant 0 : index
    %16 = vector.load %arg2[%c2_11, %c0_12, %c0_13] : memref<3x8x4xbf16, #tpu.memory_space<vmem>>, vector<1x8x4xbf16>
    %17 = vector.shape_cast %16 : vector<1x8x4xbf16> to vector<8x4xbf16>
    %cst_14 = arith.constant dense<0.000000e+00> : vector<8x128xf32>
    %18 = tpu.matmul %17, %15, %cst_14 {dimension_numbers = #tpu.dot_dimension_numbers<[1], [0], [0], [1], [0, 0, 1, 1], [], []>} : vector<8x4xbf16>, vector<4x128xbf16>, vector<8x128xf32> -> vector<8x128xf32>
    %19 = arith.addf %14, %18 : vector<8x128xf32>
    %c0_15 = arith.constant 0 : index
    %c0_16 = arith.constant 0 : index
    %20 = vector.load %arg3[%c0_15, %c0_16] : memref<8x1xf32, #tpu.memory_space<vmem>>, vector<8x1xf32>
    %21 = vector.broadcast %20 : vector<8x1xf32> to vector<8x128xf32>
    %22 = arith.addf %19, %21 : vector<8x128xf32>
    %c0_17 = arith.constant 0 : index
    %c0_18 = arith.constant 0 : index
    %c0_19 = arith.constant 0 : index
    %23 = vector.load %arg5[%c0_17, %c0_18, %c0_19] : memref<1x8x128xf32, #tpu.memory_space<vmem>>, vector<1x8x128xf32>
    %24 = vector.shape_cast %23 : vector<1x8x128xf32> to vector<8x128xf32>
    %25 = vector.shape_cast %22 : vector<8x128xf32> to vector<1x8x128xf32>
    tpu.vector_store %arg5[%c0_17, %c0_18, %c0_19], %25 {strides = array<i32>} : memref<1x8x128xf32, #tpu.memory_space<vmem>>, vector<1x8x128xf32>,
    return
  }
  func.func @transform_0(%arg0: i32, %arg1: i32) -> (i32, i32, i32) {
    %c0_i32 = arith.constant 0 : i32
    %c0_i32_0 = arith.constant 0 : i32
    %c0_i32_1 = arith.constant 0 : i32
    %c0_i32_2 = arith.constant 0 : i32
    return %c0_i32, %c0_i32_0, %c0_i32_1 : i32, i32, i32
  }
  func.func @transform_1(%arg0: i32, %arg1: i32) -> (i32, i32) {
    %c0_i32 = arith.constant 0 : i32
    %c0_i32_0 = arith.constant 0 : i32
    %c0_i32_1 = arith.constant 0 : i32
    return %c0_i32, %c0_i32_0 : i32, i32
  }
  func.func @transform_3(%arg0: i32, %arg1: i32) -> (i32, i32, i32) {
    %c0_i32 = arith.constant 0 : i32
    %c0_i32_0 = arith.constant 0 : i32
    return %arg0, %c0_i32, %arg1 : i32, i32, i32
  }
}

</mosaic_0001>

<bundles_post_ra>
// kernel: tpu_custom_call.1
= control target key start
LH: loop header
LB: loop body
LE: loop exit
PB: predicated region body
PF: predicated region fallthrough
CT: control target
= control target key end

     0   :  { %8 = vsyncpa [#allocation5], 0  ;;  %s827_s0 = inlined_call_operand.vmem [shape: bf16[3,8,4], index: 0, kind: input, shape index: {}]   ;;  %s828_s1 = inlined_call_operand.vmem [shape: f32[8,1], index: 1, kind: input, shape index: {}]   ;;  %s829_s2 = inlined_call_operand.vmem [shape: bf16[2,4,256], index: 2, kind: input, shape index: {}]   ;;  %s830_s3 = inlined_call_operand.hbm [shape: f32[2,8,14], index: 3, kind: output, shape index: {}]  }
   0x1   :  { %10 = vsyncpa [#allocation5 + $0x1], 0  ;;  %s684_s12 = smov 0   ;;  %s686_s13 = smov 0  }
   0x2   :  { %s688_s14 = smov 0   ;;  %s690_s15 = smov 0  }
   0x3   :  { %s692_s16 = smov 0   ;;  %s694_s17 = smov 0  }
   0x4 LB: > { %s471_s18 = sadd.s32 4294967295, %s656_s17   ;;  %s472_s19 = sadd.s32 4294967294, %s656_s17   ;;  %s656_s17 = sphi %s694_s17, %s16_s17   ;;  %s652_s16 = sphi %s692_s16, %s837_s16   ;;  %s648_s15 = sphi %s690_s15, %s836_s15   ;;  %s644_s14 = sphi %s688_s14, %s835_s14   ;;  %s640_s13 = sphi %s686_s13, %s834_s13   ;;  %s636_s12 = sphi %s684_s12, %s833_s12  }
   0x5   : > { %s28_s20 = sadd.s32 1, %s652_s16  ;;  %s79_s21 = sadd.s32 1, %s644_s14 }
   0x6   : > { %p30_p0 = scmp.ge.s32.totalorder %s28_s20, 2  ;;  %p89_p1 = scmp.ne.s32.totalorder %s644_s14, %s640_s13 }
   0x7   : > { %p90_p2 = scmp.eq.s32.totalorder %s471_s18, 1  ;;  %p95_p3 = scmp.ne.s32.totalorder %s640_s13, %s636_s12 }
   0x8   : > { %s839_s20 = smov (%p30_p0, %s28_s20), 0  ;;  %p96_p5 = scmp.eq.s32.totalorder %s472_s19, 1 }
   0x9   : > { %p724_p4 = por %p90_p2, %p89_p1  ;;  %s74_s23 = ssub.s32 %s652_s16, %s839_s20 }
   0xa   : > { %p474_p6 = scmp.ge.s32.totalorder %s656_s17, 1  ;;  %p77_p7 = scmp.eq.s32.totalorder %s74_s23, 0 }
   0xb   : > { %p731_p8 = por %p96_p5, %p95_p3  ;;  %p120_p9 = scmp.lt.s32.totalorder %s656_s17, 3 }
   0xc   : > { %s737_s25 = scalar_select %p77_p7, %s644_s14, %s79_s21  }
   0xd   : > { %p121_p10 = pnand %p474_p6, %p120_p9 }
   0xe   : > { %s134_s26 = sand.u32 (!%p121_p10), 1, %s640_s13   ;;  %s490_s27 = sshll.u32 (!%p121_p10), %s648_s15, 2 }
   0xf   : > { %124 = sbr.rel (%p121_p10) target bundleno = 389 (0x185), region = 28  ;;  %s743_s28 = sshll.u32 (!%p121_p10), %s134_s26, 3 }
  0x10   : > { %s144_s4 = scalar_lea.vmem (!%p121_p10), %s829_s2, %s490_s27  ;;  %s136_s5 = scalar_lea.vmem (!%p121_p10), [#allocation4], %s743_s28 }
  0x11   : > { %v162_v0 = vld [vmem:[%s144_s4] sm:$0xf] (!%p121_p10) }
  0x12   : > { %163 = vst [vmem:[#allocation2] sm:$0xf] (!%p121_p10), %v162_v0 }
  0x16   : > { %188 = vsyncadd [#allocation3], 64 }
  0x17   : > { %628 = dma.done.wait [#allocation3], 64 }
  0x18   : > { %629 = vsyncadd [#allocation3], 4294967232  ;;  %v658_v1 = vmov 0.0   ;;  %vm659_vm0 = vmmov 0   ;;  %vm217_vm1 = vcmask 1041408   ;;  %s660_s6 = smov 126  }
  0x19   : > { %497 = vmatprep.subr.bf16.mxu0 %v658_v1  ;;  %503 = vmatprep.subr.bf16.mxu1 %v658_v1  ;;  %v483_v2 = vld.sshfl [vmem:[#allocation2] sm:$0x33 pattern:$0x76325410]  ;;  %s661_s7 = smov 127   ;;  %vm213_vm2 = vcmask 31744  }
  0x1a   : > { %499 = vmatprep.mubr.msk.bf16.mxu0 %vm659_vm0, %v658_v1  ;;  %505 = vmatprep.mubr.msk.bf16.mxu1 %vm659_vm0, %v658_v1  ;;  %v193_v3 = vld [vmem:[#allocation2] sm:$0x3]  ;;  %v318_v4 = vcombine.high %v483_v2, %v483_v2  ;;  %v662_v7 = vmov 0   ;;  %vm323_vm3 = vcmask 1031168   ;;  %vm211_vm4 = vcmask 1039360   ;;  %s486_s27 = sshll.u32 %s648_s15, 7 }
  0x1b   : > { %319 = vrot.lane.b32.xlu1 %v483_v2, %s660_s6  ;;  %207 = vrot.lane.b32.xlu0 %v483_v2, %s661_s7  ;;  %v265_v5 = vsel %vm217_vm1, %v193_v3, 0  ;;  %v194_v6 = vld [vmem:[%s827_s0] sm:$0xf]  ;;  %v478_v16 = vld [vmem:[%s827_s0 + $0x4] sm:$0xf]  ;;  %s395_s29 = sshll.u32 %s136_s5, 4  ;;  %s778_s29 = int_to_ptr.vmem [resolvable:$true] %s395_s29 }
  0x1c   : > { %504 = vmatpush3.bf16.msra.mxu1 %v265_v5  ;;  %575 = vset.pattern.permute.xlu0 %v662_v7  ;;  %v372_v8 = vld [vmem:[%s828_s1] sm:$0xff]  ;;  %v482_v18 = vld [vmem:[%s827_s0 + $0x8] sm:$0xf]  ;;  %s381_s15 = scalar_lea.sflag [#allocation5], %s134_s26  ;;  %s663_s8 = smov [#allocation4]  }
  0x1d   : > { %s580_s9 = sshll.u32 %s663_s8, 4  ;;  %s581_s9 = int_to_ptr.vmem [resolvable:$false] %s580_s9 }
  0x1e   : > { %s582_s10 = scalar_lea.vmem %s581_s9, 256  ;;  %p583_p0 = scmp.lt.s32.totalorder %s778_s29, %s581_s9 }
  0x1f   : > { %321 = vrot.lane.b32.xlu1 %v318_v4, %s660_s6  ;;  %209 = vrot.lane.b32.xlu0 %v318_v4, %s661_s7  ;;  %s776_s6 = scalar_lea.hbm %s830_s3, %s486_s27  ;;  %s576_s7 = scalar_lea.vmem %s778_s29, 128 }
  0x20   : > { %506 = vmatmul.mubr.msk.bf16.vlgmr.msra.gmra.mrb[0].mxu1 %vm213_vm2, %v194_v6  ;;  %p577_p11 = scmp.ne.s32.totalorder %s778_s29, %s576_s7  ;;  %p584_p1 = scmp.lt.s32.totalorder %s582_s10, %s576_s7 }
  0x22   : > { %p578_p12 = pnand %p577_p11, %p724_p4  ;;  %p585_p2 = por %p584_p1, %p583_p0 }
  0x23   : > { %375 = vperm.xlu0 %575, %v372_v8  }
  0x24   : > { %p579_p13 = pneg %p578_p12 }
  0x26   : > { %p586_p3 = pnand %p585_p2, %p579_p13 }
  0x8d   : > { %v320_v9 = vpop.permute.xlu1 %319  ;;  %v208_v10 = vpop.permute.xlu0 %207 }
  0x91   : > { %v322_v11 = vpop.permute.xlu1 %321  ;;  %v210_v12 = vpop.permute.xlu0 %209 }
  0x92   : > { %v324_v13 = vsel %vm323_vm3, %v320_v9, %v322_v11  ;;  %v212_v14 = vsel %vm211_vm4, %v208_v10, %v210_v12 }
  0x93   : > { %v219_v15 = vsel %vm217_vm1, %v212_v14, 0  ;;  %v329_v17 = vsel %vm217_vm1, %v324_v13, 0 }
  0x94   : > { %498 = vmatpush3.bf16.msra.mxu0 %v219_v15 }
  0x95   : > { %509 = vmatprep.subr.bf16.mxu0 %v658_v1 }
  0x97   : > { %500 = vmatmul.mubr.msk.bf16.vlgmr.msra.gmra.mrb[0].mxu0 %vm213_vm2, %v478_v16 }
  0x98   : > { %510 = vmatpush3.bf16.msra.mxu0 %v329_v17  ;;  %511 = vmatprep.mubr.msk.bf16.mxu0 %vm659_vm0, %v658_v1 }
  0x9f   : > { %512 = vmatmul.mubr.msk.bf16.vlgmr.msra.gmra.mrb[4].mxu0 %vm213_vm2, %v482_v18 }
  0xa2   : > { %v376_v29 = vpop.permute.xlu0 %375 }
  0xf3   : > { %v301_v19 = vpop.f32.mrb[0].mxu1 }
  0xf4   : > { %v507_v20 = vpop.f32.mrb[1].mxu1 }
  0xf5   : > { %v304_v21 = vpop.f32.mrb[2].mxu1 }
  0xf6   : > { %v508_v22 = vpop.f32.mrb[3].mxu1 }
 0x16a   : > { %v255_v23 = vpop.f32.mrb[0].mxu0 }
 0x16b   : > { %v501_v24 = vpop.f32.mrb[1].mxu0  ;;  %v302_v25 = vadd.f32 %v301_v19, %v255_v23 }
 0x16c   : > { %v258_v26 = vpop.f32.mrb[2].mxu0 }
 0x16d   : > { %v502_v27 = vpop.f32.mrb[3].mxu0 }
 0x172   : > { %v365_v28 = vpop.f32.mrb[4].mxu0 }
 0x173   : > { %v371_v30 = vadd.f32 %v365_v28, %v302_v25  ;;  %v513_v31 = vpop.f32.mrb[5].mxu0 }
 0x174   : > { %v368_v32 = vpop.f32.mrb[6].mxu0 }
 0x175   : > { %v378_v33 = vadd.f32 %v376_v29, %v371_v30  ;;  %v514_v34 = vpop.f32.mrb[7].mxu0 }
 0x177   : > { %379 = vst [vmem:[%s136_s5] sm:$0xff] %v378_v33 }
 0x178   : > { %589 = shalt.err (!%p586_p3)
}
 0x179   : > { %s590_s26 = scalar_lea.hbm %s776_s6, 128  ;;  %s594_s11 = scalar_lea.hbm %s830_s3, 256 }
 0x17a   : > { %p591_p5 = scmp.ne.s32.totalorder %s776_s6, %s590_s26  ;;  %p595_p9 = scmp.lt.u32.totalorder %s776_s6, %s830_s3 }
 0x17b   : > { %p596_p10 = scmp.lt.u32.totalorder %s594_s11, %s590_s26  ;;  %p598_p12 = scmp.lt.u32.totalorder %s590_s26, %s776_s6 }
 0x17c   : > { %p592_p6 = pnand %p591_p5, %p724_p4 }
 0x17d   : > { %p597_p11 = por %p596_p10, %p595_p9 }
 0x17e   : > { %p593_p7 = pneg %p592_p6 }
 0x17f   : > { %p599_p13 = por %p598_p12, %p597_p11 }
 0x181   : > { %p600_p0 = pnand %p599_p13, %p593_p7 }
 0x183   : > { %603 = shalt.err (!%p600_p0)
}
 0x184   : > { %515 = dma.vmem_to_hbm [thread:$0]  (%p724_p4), %s778_s29, 128, %s776_s6, %s381_s15  }
 0x185 PF: > { %p521_p1 = scmp.ge.s32.totalorder %s656_s17, 2  ;;  %s407_s21 = sand.u32 1, %s636_s12  }
 0x186   : > { %s408_s23 = scalar_lea.sflag [#allocation5], %s407_s21 }
 0x187   : > { %p518_p2 = pnand %p521_p1, %p731_p8 }
 0x189   : > { %631 = dma.done.wait (!%p518_p2), %s408_s23, 128  }
 0x18a   : > { %633 = vsyncadd (!%p518_p2), %s408_s23, 4294967168  ;;  %s16_s17 = sadd.s32 1, %s656_s17   ;;  %s833_s12 = smov %s640_s13 }
 0x18b   : > { %p13_p3 = scmp.ge.s32.totalorder %s16_s17, 4   ;;  %s834_s13 = smov %s644_s14 }
 0x18c   : > { %s835_s14 = smov %s737_s25  ;;  %s836_s15 = smov %s652_s16 }
 0x18d   : > { %s837_s16 = smov %s839_s20  ;;  %15 = sbr.rel (!%p13_p3) target bundleno = 4 (0x4), region = 103 }
 0x194   :  { %413 = vsyncpa [#allocation5], 1 }
 0x195   :  { %415 = vsyncpa [#allocation5 + $0x1], 1 }
 0x196   :  { %416 = vsyncmov [#allocation3] }
 0x199   :  { %s417_s22 = vpop.sfrf %416 }
 0x19a   :  { %p489_p4 = scmp.ne.s32.totalorder %s417_s22, 0 }
 0x19c   :  { %421 = shalt.err (%p489_p4)  }

</bundles_post_ra>
